<compile_context>
chip_gen: v6e
topology: v6e:2x2x1
jax: 0.10.0
libtpu: 0.0.40
codegen_flags: <defaults>
</compile_context>

<pallas_src>
import functools

import jax
import jax.numpy as jnp
from jax import lax
from jax.experimental import pallas as pl

# Small stand-in sizes (roberta-large would be H=1024, FFN=4096, 24 layers).
HIDDEN = 32
FFN = 64
NUM_HEADS = 2
HEAD_DIM = HIDDEN // NUM_HEADS
CLS_NUM = 7
OUT_PAD = 128            # lane-dense padded logits width (slice to CLS_NUM outside)
VOCAB = 64
MAX_POS = 64
EPS = 1e-5


def _layernorm(x, gamma, beta):
    mean = jnp.mean(x, axis=-1, keepdims=True)
    var = jnp.mean((x - mean) ** 2, axis=-1, keepdims=True)
    return (x - mean) * lax.rsqrt(var + EPS) * gamma + beta


def pm_erc_kernel(x_ref, xcls_ref, wq_ref, wk_ref, wv_ref, bqkv_ref, wo_ref,
                  w1_ref, b1_ref, w2_ref, vecs_ref, wcls_ref, bcls_ref,
                  out_ref, *, batch, seq):
    """Fused encoder layer (CLS-query only) + classification head.

    x_ref:    (batch*seq, H) f32 token+position embeddings (flattened).
    xcls_ref: (batch, H)     f32 CLS-row embeddings (row b*seq of x).
    wq/wk/wv: (NUM_HEADS, H, HEAD_DIM) bf16, wo: (NUM_HEADS, HEAD_DIM, H) bf16.
    bqkv_ref: (3*NUM_HEADS, HEAD_DIM) f32 rows [bq_h.., bk_h.., bv_h..].
    vecs_ref: (6, H) f32 rows [bo, ln1_gamma, ln1_beta, b2, ln2_gamma, ln2_beta].
    wcls_ref: (H, OUT_PAD) bf16 (columns >= CLS_NUM are zero), bcls: (1, OUT_PAD).
    out_ref:  (batch, OUT_PAD) f32 lane-dense logits slab.
    """
    x_bf = x_ref[...].astype(jnp.bfloat16)           # (BS, H) MXU operand
    xcls = xcls_ref[...]                              # (B, H) f32
    xcls_bf = xcls.astype(jnp.bfloat16)

    scale = jnp.float32(1.0 / (HEAD_DIM ** 0.5))

    # Block-diagonal mask: CLS query of batch b attends only to batch b's rows.
    # TODO(synk): no padding mask (HF defaults attention_mask to all-ones when
    # the forward passes only batch_input_tokens, matching the reference call).
    row = lax.broadcasted_iota(jnp.int32, (batch, batch * seq), 0)
    col = lax.broadcasted_iota(jnp.int32, (batch, batch * seq), 1)
    mask = (col >= row * seq) & (col < (row + 1) * seq)

    # ---- multi-head attention, CLS query rows only (static unroll over the
    # 2 heads; switch to lax.fori_loop(unroll=True) if NUM_HEADS grows).
    attn = jnp.zeros((batch, HIDDEN), jnp.float32)
    for h in range(NUM_HEADS):
        q_h = (jnp.dot(xcls_bf, wq_ref[h], preferred_element_type=jnp.float32)
               + bqkv_ref[0 * NUM_HEADS + h:0 * NUM_HEADS + h + 1, :])   # (B, HD)
        k_h = (jnp.dot(x_bf, wk_ref[h], preferred_element_type=jnp.float32)
               + bqkv_ref[1 * NUM_HEADS + h:1 * NUM_HEADS + h + 1, :])   # (BS, HD)
        v_h = (jnp.dot(x_bf, wv_ref[h], preferred_element_type=jnp.float32)
               + bqkv_ref[2 * NUM_HEADS + h:2 * NUM_HEADS + h + 1, :])   # (BS, HD)

        scores = jnp.dot(q_h.astype(jnp.bfloat16), k_h.astype(jnp.bfloat16).T,
                         preferred_element_type=jnp.float32) * scale     # (B, BS)
        scores = jnp.where(mask, scores, jnp.float32(-1e30))
        scores = scores - jnp.max(scores, axis=-1, keepdims=True)
        p = jnp.exp(scores)
        p = p * pl.reciprocal(jnp.sum(p, axis=-1, keepdims=True), approx=True)

        o_h = jnp.dot(p.astype(jnp.bfloat16), v_h.astype(jnp.bfloat16),
                      preferred_element_type=jnp.float32)                # (B, HD)
        attn = attn + jnp.dot(o_h.astype(jnp.bfloat16), wo_ref[h],
                              preferred_element_type=jnp.float32)        # (B, H)

    attn = attn + vecs_ref[0:1, :]                                       # + bo

    h1 = _layernorm(xcls + attn, vecs_ref[1:2, :], vecs_ref[2:3, :])     # (B, H)

    # ---- FFN on CLS rows only (elementwise math in f32; MXU operands bf16).
    # TODO(synk): jax.nn.gelu here is the tanh approximation; HF RoBERTa uses
    # the exact erf GELU (small numeric mismatch vs pretrained weights).
    ff = (jnp.dot(h1.astype(jnp.bfloat16), w1_ref[...],
                  preferred_element_type=jnp.float32) + b1_ref[...])      # (B, FFN)
    ff = jax.nn.gelu(ff)
    ff = (jnp.dot(ff.astype(jnp.bfloat16), w2_ref[...],
                  preferred_element_type=jnp.float32) + vecs_ref[3:4, :]) # (B, H)

    h2 = _layernorm(h1 + ff, vecs_ref[4:5, :], vecs_ref[5:6, :])          # (B, H)

    # ---- classification head: lane-dense (B, OUT_PAD) store.
    logits = (jnp.dot(h2.astype(jnp.bfloat16), wcls_ref[...],
                      preferred_element_type=jnp.float32) + bcls_ref[...])
    out_ref[...] = logits.astype(out_ref.dtype)


def run_pm_erc(x_flat, x_cls, params, batch, seq):
    kernel = functools.partial(pm_erc_kernel, batch=batch, seq=seq)
    # No grid at toy sizes: whole problem in one invocation, full arrays
    # auto-DMA'd to VMEM, only the (B, 128) logits slab written back.
    return pl.pallas_call(
        kernel,
        out_shape=jax.ShapeDtypeStruct((batch, OUT_PAD), jnp.float32),
    )(x_flat, x_cls, params["wq"], params["wk"], params["wv"], params["bqkv"],
      params["wo"], params["w1"], params["b1"], params["w2"], params["vecs"],
      params["W"], params["Wb"])


def init_params(key):
    ks = jax.random.split(key, 9)

    def n(k, shape, s=0.05, dtype=jnp.bfloat16):
        return (s * jax.random.normal(k, shape)).astype(dtype)

    vecs = jnp.stack([
        jnp.zeros((HIDDEN,), jnp.float32),   # bo        (attn out-proj bias)
        jnp.ones((HIDDEN,), jnp.float32),    # ln1 gamma
        jnp.zeros((HIDDEN,), jnp.float32),   # ln1 beta
        jnp.zeros((HIDDEN,), jnp.float32),   # b2        (FFN second bias)
        jnp.ones((HIDDEN,), jnp.float32),    # ln2 gamma
        jnp.zeros((HIDDEN,), jnp.float32),   # ln2 beta
    ], axis=0)                                           # (6, H) f32

    # Classification weight padded to 128 lanes (columns >= CLS_NUM are zero).
    wcls = jnp.zeros((HIDDEN, OUT_PAD), jnp.float32)
    wcls = wcls.at[:, :CLS_NUM].set(
        0.1 * jax.random.normal(ks[8], (HIDDEN, CLS_NUM))).astype(jnp.bfloat16)

    return dict(
        word_emb=n(ks[0], (VOCAB, HIDDEN), 0.1, jnp.float32),
        pos_emb=n(ks[1], (MAX_POS, HIDDEN), 0.1, jnp.float32),
        # per-head projection weights: no lane slicing needed in-kernel.
        wq=n(ks[2], (NUM_HEADS, HIDDEN, HEAD_DIM)),
        wk=n(ks[3], (NUM_HEADS, HIDDEN, HEAD_DIM)),
        wv=n(ks[4], (NUM_HEADS, HIDDEN, HEAD_DIM)),
        bqkv=jnp.zeros((3 * NUM_HEADS, HEAD_DIM), jnp.float32),
        wo=n(ks[5], (NUM_HEADS, HEAD_DIM, HIDDEN)),
        w1=n(ks[6], (HIDDEN, FFN)),
        b1=jnp.zeros((1, FFN), jnp.float32),
        w2=n(ks[7], (FFN, HIDDEN)),
        vecs=vecs,
        W=wcls,                                          # (H, OUT_PAD) bf16
        Wb=jnp.zeros((1, OUT_PAD), jnp.float32),
    )


@jax.jit
def pm_erc_forward(batch_input_tokens, params):
    # TODO(synk): token-embedding gather stays in JAX glue (jnp.take); at real
    # sizes it should be fused via PrefetchScalarGridSpec + a row-gather spec.
    B, S = batch_input_tokens.shape
    x = jnp.take(params["word_emb"], batch_input_tokens, axis=0)        # (B, S, H)
    x = x + params["pos_emb"][:S][None, :, :]
    x_cls = x[:, 0, :]                                                  # (B, H)
    x_flat = x.reshape(B * S, HIDDEN)                                   # (BS, H)
    logits_padded = run_pm_erc(x_flat, x_cls, params, B, S)             # (B, 128)
    return logits_padded[:, :CLS_NUM]                                   # (B, clsNum)


if __name__ == "__main__":
    key = jax.random.PRNGKey(0)
    pkey, tkey = jax.random.split(key)
    params = init_params(pkey)

    B, S = 2, 8
    tokens = jax.random.randint(tkey, (B, S), 0, VOCAB, dtype=jnp.int32)
    # first token is the [CLS] special token (like tokenizer.add_special_tokens)
    tokens = tokens.at[:, 0].set(VOCAB - 1)

    logits = pm_erc_forward(tokens, params)
    jax.block_until_ready(logits)
    assert logits.shape == (B, CLS_NUM) and logits.dtype == jnp.float32
    print("KERNEL_OK")
</pallas_src>

<mosaic_0001>
module attributes {stable_mosaic.version = 11 : i64} {
  func.func @pm_erc_kernel(%arg0: memref<16x32xf32, #tpu.memory_space<vmem>>, %arg1: memref<2x32xf32, #tpu.memory_space<vmem>>, %arg2: memref<2x32x16xbf16, #tpu.memory_space<vmem>>, %arg3: memref<2x32x16xbf16, #tpu.memory_space<vmem>>, %arg4: memref<2x32x16xbf16, #tpu.memory_space<vmem>>, %arg5: memref<6x16xf32, #tpu.memory_space<vmem>>, %arg6: memref<2x16x32xbf16, #tpu.memory_space<vmem>>, %arg7: memref<32x64xbf16, #tpu.memory_space<vmem>>, %arg8: memref<1x64xf32, #tpu.memory_space<vmem>>, %arg9: memref<64x32xbf16, #tpu.memory_space<vmem>>, %arg10: memref<6x32xf32, #tpu.memory_space<vmem>>, %arg11: memref<32x128xbf16, #tpu.memory_space<vmem>>, %arg12: memref<1x128xf32, #tpu.memory_space<vmem>>, %arg13: memref<2x128xf32, #tpu.memory_space<vmem>>) attributes {dimension_semantics = [], scalar_prefetch = 0 : i64, scratch_operands = 0 : i64, tpu.core_type = #tpu.core_type<tc>} {
    %c0 = arith.constant 0 : index
    %c0_0 = arith.constant 0 : index
    %0 = vector.load %arg0[%c0, %c0_0] : memref<16x32xf32, #tpu.memory_space<vmem>>, vector<16x32xf32>
    %1 = arith.truncf %0 : vector<16x32xf32> to vector<16x32xbf16>
    %c0_1 = arith.constant 0 : index
    %c0_2 = arith.constant 0 : index
    %2 = vector.load %arg1[%c0_1, %c0_2] : memref<2x32xf32, #tpu.memory_space<vmem>>, vector<2x32xf32>
    %3 = arith.truncf %2 : vector<2x32xf32> to vector<2x32xbf16>
    %4 = tpu.iota {dimensions = array<i32: 0>} : vector<2x16xi32>
    %5 = tpu.iota {dimensions = array<i32: 1>} : vector<2x16xi32>
    %c8_i32 = arith.constant 8 : i32
    %6 = vector.broadcast %c8_i32 : i32 to vector<2x16xi32>
    %7 = arith.muli %4, %6 : vector<2x16xi32>
    %8 = arith.cmpi sge, %5, %7 : vector<2x16xi32>
    %c1_i32 = arith.constant 1 : i32
    %9 = vector.broadcast %c1_i32 : i32 to vector<2x16xi32>
    %10 = arith.addi %4, %9 : vector<2x16xi32>
    %c8_i32_3 = arith.constant 8 : i32
    %11 = vector.broadcast %c8_i32_3 : i32 to vector<2x16xi32>
    %12 = arith.muli %10, %11 : vector<2x16xi32>
    %13 = arith.cmpi slt, %5, %12 : vector<2x16xi32>
    %14 = arith.andi %8, %13 : vector<2x16xi1>
    %cst = arith.constant 0.000000e+00 : f32
    %15 = vector.broadcast %cst : f32 to vector<2x32xf32>
    %c0_4 = arith.constant 0 : index
    %c0_5 = arith.constant 0 : index
    %c0_6 = arith.constant 0 : index
    %16 = vector.load %arg2[%c0_4, %c0_5, %c0_6] : memref<2x32x16xbf16, #tpu.memory_space<vmem>>, vector<1x32x16xbf16>
    %17 = vector.shape_cast %16 : vector<1x32x16xbf16> to vector<32x16xbf16>
    %cst_7 = arith.constant dense<0.000000e+00> : vector<2x16xf32>
    %18 = tpu.matmul %3, %17, %cst_7 {dimension_numbers = #tpu.dot_dimension_numbers<[1], [0], [0], [1], [0, 0, 1, 1], [], []>} : vector<2x32xbf16>, vector<32x16xbf16>, vector<2x16xf32> -> vector<2x16xf32>
    %c0_8 = arith.constant 0 : index
    %c0_9 = arith.constant 0 : index
    %19 = vector.load %arg5[%c0_8, %c0_9] : memref<6x16xf32, #tpu.memory_space<vmem>>, vector<1x16xf32>
    %20 = vector.broadcast %19 : vector<1x16xf32> to vector<2x16xf32>
    %21 = arith.addf %18, %20 : vector<2x16xf32>
    %c0_10 = arith.constant 0 : index
    %c0_11 = arith.constant 0 : index
    %c0_12 = arith.constant 0 : index
    %22 = vector.load %arg3[%c0_10, %c0_11, %c0_12] : memref<2x32x16xbf16, #tpu.memory_space<vmem>>, vector<1x32x16xbf16>
    %23 = vector.shape_cast %22 : vector<1x32x16xbf16> to vector<32x16xbf16>
    %cst_13 = arith.constant dense<0.000000e+00> : vector<16x16xf32>
    %24 = tpu.matmul %1, %23, %cst_13 {dimension_numbers = #tpu.dot_dimension_numbers<[1], [0], [0], [1], [0, 0, 1, 1], [], []>} : vector<16x32xbf16>, vector<32x16xbf16>, vector<16x16xf32> -> vector<16x16xf32>
    %c2 = arith.constant 2 : index
    %c0_14 = arith.constant 0 : index
    %25 = vector.load %arg5[%c2, %c0_14] : memref<6x16xf32, #tpu.memory_space<vmem>>, vector<1x16xf32>
    %26 = vector.broadcast %25 : vector<1x16xf32> to vector<16x16xf32>
    %27 = arith.addf %24, %26 : vector<16x16xf32>
    %c0_15 = arith.constant 0 : index
    %c0_16 = arith.constant 0 : index
    %c0_17 = arith.constant 0 : index
    %28 = vector.load %arg4[%c0_15, %c0_16, %c0_17] : memref<2x32x16xbf16, #tpu.memory_space<vmem>>, vector<1x32x16xbf16>
    %29 = vector.shape_cast %28 : vector<1x32x16xbf16> to vector<32x16xbf16>
    %cst_18 = arith.constant dense<0.000000e+00> : vector<16x16xf32>
    %30 = tpu.matmul %1, %29, %cst_18 {dimension_numbers = #tpu.dot_dimension_numbers<[1], [0], [0], [1], [0, 0, 1, 1], [], []>} : vector<16x32xbf16>, vector<32x16xbf16>, vector<16x16xf32> -> vector<16x16xf32>
    %c4 = arith.constant 4 : index
    %c0_19 = arith.constant 0 : index
    %31 = vector.load %arg5[%c4, %c0_19] : memref<6x16xf32, #tpu.memory_space<vmem>>, vector<1x16xf32>
    %32 = vector.broadcast %31 : vector<1x16xf32> to vector<16x16xf32>
    %33 = arith.addf %30, %32 : vector<16x16xf32>
    %34 = arith.truncf %21 : vector<2x16xf32> to vector<2x16xbf16>
    %35 = arith.truncf %27 : vector<16x16xf32> to vector<16x16xbf16>
    %36 = tpu.transpose %35, [1, 0] : vector<16x16xbf16> -> vector<16x16xbf16>
    %cst_20 = arith.constant dense<0.000000e+00> : vector<2x16xf32>
    %37 = tpu.matmul %34, %36, %cst_20 {dimension_numbers = #tpu.dot_dimension_numbers<[1], [0], [0], [1], [0, 0, 1, 1], [], []>} : vector<2x16xbf16>, vector<16x16xbf16>, vector<2x16xf32> -> vector<2x16xf32>
    %cst_21 = arith.constant 2.500000e-01 : f32
    %38 = vector.broadcast %cst_21 : f32 to vector<2x16xf32>
    %39 = arith.mulf %37, %38 : vector<2x16xf32>
    %cst_22 = arith.constant -1.000000e+30 : f32
    %40 = vector.broadcast %cst_22 : f32 to vector<2x16xf32>
    %41 = arith.select %14, %39, %40 : vector<2x16xi1>, vector<2x16xf32>
    %cst_23 = arith.constant dense<0xFF800000> : vector<2xf32>
    %42 = vector.multi_reduction <maximumf>, %41, %cst_23 [1] : vector<2x16xf32> to vector<2xf32>
    %43 = vector.shape_cast %42 : vector<2xf32> to vector<2x1xf32>
    %44 = vector.broadcast %43 : vector<2x1xf32> to vector<2x16xf32>
    %45 = arith.subf %41, %44 : vector<2x16xf32>
    %46 = math.exp %45 : vector<2x16xf32>
    %cst_24 = arith.constant dense<0.000000e+00> : vector<2xf32>
    %47 = vector.multi_reduction <add>, %46, %cst_24 [1] : vector<2x16xf32> to vector<2xf32>
    %48 = vector.shape_cast %47 : vector<2xf32> to vector<2x1xf32>
    %49 = tpu.reciprocal %48 {approx = true} : vector<2x1xf32> -> vector<2x1xf32>
    %50 = vector.broadcast %49 : vector<2x1xf32> to vector<2x16xf32>
    %51 = arith.mulf %46, %50 : vector<2x16xf32>
    %52 = arith.truncf %51 : vector<2x16xf32> to vector<2x16xbf16>
    %53 = arith.truncf %33 : vector<16x16xf32> to vector<16x16xbf16>
    %cst_25 = arith.constant dense<0.000000e+00> : vector<2x16xf32>
    %54 = tpu.matmul %52, %53, %cst_25 {dimension_numbers = #tpu.dot_dimension_numbers<[1], [0], [0], [1], [0, 0, 1, 1], [], []>} : vector<2x16xbf16>, vector<16x16xbf16>, vector<2x16xf32> -> vector<2x16xf32>
    %55 = arith.truncf %54 : vector<2x16xf32> to vector<2x16xbf16>
    %c0_26 = arith.constant 0 : index
    %c0_27 = arith.constant 0 : index
    %c0_28 = arith.constant 0 : index
    %56 = vector.load %arg6[%c0_26, %c0_27, %c0_28] : memref<2x16x32xbf16, #tpu.memory_space<vmem>>, vector<1x16x32xbf16>
    %57 = vector.shape_cast %56 : vector<1x16x32xbf16> to vector<16x32xbf16>
    %cst_29 = arith.constant dense<0.000000e+00> : vector<2x32xf32>
    %58 = tpu.matmul %55, %57, %cst_29 {dimension_numbers = #tpu.dot_dimension_numbers<[1], [0], [0], [1], [0, 0, 1, 1], [], []>} : vector<2x16xbf16>, vector<16x32xbf16>, vector<2x32xf32> -> vector<2x32xf32>
    %59 = arith.addf %15, %58 : vector<2x32xf32>
    %c1 = arith.constant 1 : index
    %c0_30 = arith.constant 0 : index
    %c0_31 = arith.constant 0 : index
    %60 = vector.load %arg2[%c1, %c0_30, %c0_31] : memref<2x32x16xbf16, #tpu.memory_space<vmem>>, vector<1x32x16xbf16>
    %61 = vector.shape_cast %60 : vector<1x32x16xbf16> to vector<32x16xbf16>
    %cst_32 = arith.constant dense<0.000000e+00> : vector<2x16xf32>
    %62 = tpu.matmul %3, %61, %cst_32 {dimension_numbers = #tpu.dot_dimension_numbers<[1], [0], [0], [1], [0, 0, 1, 1], [], []>} : vector<2x32xbf16>, vector<32x16xbf16>, vector<2x16xf32> -> vector<2x16xf32>
    %c1_33 = arith.constant 1 : index
    %c0_34 = arith.constant 0 : index
    %63 = vector.load %arg5[%c1_33, %c0_34] : memref<6x16xf32, #tpu.memory_space<vmem>>, vector<1x16xf32>
    %64 = vector.broadcast %63 : vector<1x16xf32> to vector<2x16xf32>
    %65 = arith.addf %62, %64 : vector<2x16xf32>
    %c1_35 = arith.constant 1 : index
    %c0_36 = arith.constant 0 : index
    %c0_37 = arith.constant 0 : index
    %66 = vector.load %arg3[%c1_35, %c0_36, %c0_37] : memref<2x32x16xbf16, #tpu.memory_space<vmem>>, vector<1x32x16xbf16>
    %67 = vector.shape_cast %66 : vector<1x32x16xbf16> to vector<32x16xbf16>
    %cst_38 = arith.constant dense<0.000000e+00> : vector<16x16xf32>
    %68 = tpu.matmul %1, %67, %cst_38 {dimension_numbers = #tpu.dot_dimension_numbers<[1], [0], [0], [1], [0, 0, 1, 1], [], []>} : vector<16x32xbf16>, vector<32x16xbf16>, vector<16x16xf32> -> vector<16x16xf32>
    %c3 = arith.constant 3 : index
    %c0_39 = arith.constant 0 : index
    %69 = vector.load %arg5[%c3, %c0_39] : memref<6x16xf32, #tpu.memory_space<vmem>>, vector<1x16xf32>
    %70 = vector.broadcast %69 : vector<1x16xf32> to vector<16x16xf32>
    %71 = arith.addf %68, %70 : vector<16x16xf32>
    %c1_40 = arith.constant 1 : index
    %c0_41 = arith.constant 0 : index
    %c0_42 = arith.constant 0 : index
    %72 = vector.load %arg4[%c1_40, %c0_41, %c0_42] : memref<2x32x16xbf16, #tpu.memory_space<vmem>>, vector<1x32x16xbf16>
    %73 = vector.shape_cast %72 : vector<1x32x16xbf16> to vector<32x16xbf16>
    %cst_43 = arith.constant dense<0.000000e+00> : vector<16x16xf32>
    %74 = tpu.matmul %1, %73, %cst_43 {dimension_numbers = #tpu.dot_dimension_numbers<[1], [0], [0], [1], [0, 0, 1, 1], [], []>} : vector<16x32xbf16>, vector<32x16xbf16>, vector<16x16xf32> -> vector<16x16xf32>
    %c5 = arith.constant 5 : index
    %c0_44 = arith.constant 0 : index
    %75 = vector.load %arg5[%c5, %c0_44] : memref<6x16xf32, #tpu.memory_space<vmem>>, vector<1x16xf32>
    %76 = vector.broadcast %75 : vector<1x16xf32> to vector<16x16xf32>
    %77 = arith.addf %74, %76 : vector<16x16xf32>
    %78 = arith.truncf %65 : vector<2x16xf32> to vector<2x16xbf16>
    %79 = arith.truncf %71 : vector<16x16xf32> to vector<16x16xbf16>
    %80 = tpu.transpose %79, [1, 0] : vector<16x16xbf16> -> vector<16x16xbf16>
    %cst_45 = arith.constant dense<0.000000e+00> : vector<2x16xf32>
    %81 = tpu.matmul %78, %80, %cst_45 {dimension_numbers = #tpu.dot_dimension_numbers<[1], [0], [0], [1], [0, 0, 1, 1], [], []>} : vector<2x16xbf16>, vector<16x16xbf16>, vector<2x16xf32> -> vector<2x16xf32>
    %cst_46 = arith.constant 2.500000e-01 : f32
    %82 = vector.broadcast %cst_46 : f32 to vector<2x16xf32>
    %83 = arith.mulf %81, %82 : vector<2x16xf32>
    %cst_47 = arith.constant -1.000000e+30 : f32
    %84 = vector.broadcast %cst_47 : f32 to vector<2x16xf32>
    %85 = arith.select %14, %83, %84 : vector<2x16xi1>, vector<2x16xf32>
    %cst_48 = arith.constant dense<0xFF800000> : vector<2xf32>
    %86 = vector.multi_reduction <maximumf>, %85, %cst_48 [1] : vector<2x16xf32> to vector<2xf32>
    %87 = vector.shape_cast %86 : vector<2xf32> to vector<2x1xf32>
    %88 = vector.broadcast %87 : vector<2x1xf32> to vector<2x16xf32>
    %89 = arith.subf %85, %88 : vector<2x16xf32>
    %90 = math.exp %89 : vector<2x16xf32>
    %cst_49 = arith.constant dense<0.000000e+00> : vector<2xf32>
    %91 = vector.multi_reduction <add>, %90, %cst_49 [1] : vector<2x16xf32> to vector<2xf32>
    %92 = vector.shape_cast %91 : vector<2xf32> to vector<2x1xf32>
    %93 = tpu.reciprocal %92 {approx = true} : vector<2x1xf32> -> vector<2x1xf32>
    %94 = vector.broadcast %93 : vector<2x1xf32> to vector<2x16xf32>
    %95 = arith.mulf %90, %94 : vector<2x16xf32>
    %96 = arith.truncf %95 : vector<2x16xf32> to vector<2x16xbf16>
    %97 = arith.truncf %77 : vector<16x16xf32> to vector<16x16xbf16>
    %cst_50 = arith.constant dense<0.000000e+00> : vector<2x16xf32>
    %98 = tpu.matmul %96, %97, %cst_50 {dimension_numbers = #tpu.dot_dimension_numbers<[1], [0], [0], [1], [0, 0, 1, 1], [], []>} : vector<2x16xbf16>, vector<16x16xbf16>, vector<2x16xf32> -> vector<2x16xf32>
    %99 = arith.truncf %98 : vector<2x16xf32> to vector<2x16xbf16>
    %c1_51 = arith.constant 1 : index
    %c0_52 = arith.constant 0 : index
    %c0_53 = arith.constant 0 : index
    %100 = vector.load %arg6[%c1_51, %c0_52, %c0_53] : memref<2x16x32xbf16, #tpu.memory_space<vmem>>, vector<1x16x32xbf16>
    %101 = vector.shape_cast %100 : vector<1x16x32xbf16> to vector<16x32xbf16>
    %cst_54 = arith.constant dense<0.000000e+00> : vector<2x32xf32>
    %102 = tpu.matmul %99, %101, %cst_54 {dimension_numbers = #tpu.dot_dimension_numbers<[1], [0], [0], [1], [0, 0, 1, 1], [], []>} : vector<2x16xbf16>, vector<16x32xbf16>, vector<2x32xf32> -> vector<2x32xf32>
    %103 = arith.addf %59, %102 : vector<2x32xf32>
    %c0_55 = arith.constant 0 : index
    %c0_56 = arith.constant 0 : index
    %104 = vector.load %arg10[%c0_55, %c0_56] : memref<6x32xf32, #tpu.memory_space<vmem>>, vector<1x32xf32>
    %105 = vector.broadcast %104 : vector<1x32xf32> to vector<2x32xf32>
    %106 = arith.addf %103, %105 : vector<2x32xf32>
    %107 = arith.addf %2, %106 : vector<2x32xf32>
    %c1_57 = arith.constant 1 : index
    %c0_58 = arith.constant 0 : index
    %108 = vector.load %arg10[%c1_57, %c0_58] : memref<6x32xf32, #tpu.memory_space<vmem>>, vector<1x32xf32>
    %c2_59 = arith.constant 2 : index
    %c0_60 = arith.constant 0 : index
    %109 = vector.load %arg10[%c2_59, %c0_60] : memref<6x32xf32, #tpu.memory_space<vmem>>, vector<1x32xf32>
    %cst_61 = arith.constant dense<0.000000e+00> : vector<2xf32>
    %110 = vector.multi_reduction <add>, %107, %cst_61 [1] : vector<2x32xf32> to vector<2xf32>
    %111 = vector.shape_cast %110 : vector<2xf32> to vector<2x1xf32>
    %cst_62 = arith.constant 3.200000e+01 : f32
    %112 = vector.broadcast %cst_62 : f32 to vector<2x1xf32>
    %113 = arith.divf %111, %112 : vector<2x1xf32>
    %114 = vector.broadcast %113 : vector<2x1xf32> to vector<2x32xf32>
    %115 = arith.subf %107, %114 : vector<2x32xf32>
    %116 = arith.mulf %115, %115 : vector<2x32xf32>
    %cst_63 = arith.constant dense<0.000000e+00> : vector<2xf32>
    %117 = vector.multi_reduction <add>, %116, %cst_63 [1] : vector<2x32xf32> to vector<2xf32>
    %118 = vector.shape_cast %117 : vector<2xf32> to vector<2x1xf32>
    %cst_64 = arith.constant 3.200000e+01 : f32
    %119 = vector.broadcast %cst_64 : f32 to vector<2x1xf32>
    %120 = arith.divf %118, %119 : vector<2x1xf32>
    %121 = vector.broadcast %113 : vector<2x1xf32> to vector<2x32xf32>
    %122 = arith.subf %107, %121 : vector<2x32xf32>
    %cst_65 = arith.constant 9.99999974E-6 : f32
    %123 = vector.broadcast %cst_65 : f32 to vector<2x1xf32>
    %124 = arith.addf %120, %123 : vector<2x1xf32>
    %125 = math.rsqrt %124 : vector<2x1xf32>
    %126 = vector.broadcast %125 : vector<2x1xf32> to vector<2x32xf32>
    %127 = arith.mulf %122, %126 : vector<2x32xf32>
    %128 = vector.broadcast %108 : vector<1x32xf32> to vector<2x32xf32>
    %129 = arith.mulf %127, %128 : vector<2x32xf32>
    %130 = vector.broadcast %109 : vector<1x32xf32> to vector<2x32xf32>
    %131 = arith.addf %129, %130 : vector<2x32xf32>
    %132 = arith.truncf %131 : vector<2x32xf32> to vector<2x32xbf16>
    %c0_66 = arith.constant 0 : index
    %c0_67 = arith.constant 0 : index
    %133 = vector.load %arg7[%c0_66, %c0_67] : memref<32x64xbf16, #tpu.memory_space<vmem>>, vector<32x64xbf16>
    %cst_68 = arith.constant dense<0.000000e+00> : vector<2x64xf32>
    %134 = tpu.matmul %132, %133, %cst_68 {dimension_numbers = #tpu.dot_dimension_numbers<[1], [0], [0], [1], [0, 0, 1, 1], [], []>} : vector<2x32xbf16>, vector<32x64xbf16>, vector<2x64xf32> -> vector<2x64xf32>
    %c0_69 = arith.constant 0 : index
    %c0_70 = arith.constant 0 : index
    %135 = vector.load %arg8[%c0_69, %c0_70] : memref<1x64xf32, #tpu.memory_space<vmem>>, vector<1x64xf32>
    %136 = vector.broadcast %135 : vector<1x64xf32> to vector<2x64xf32>
    %137 = arith.addf %134, %136 : vector<2x64xf32>
    %138 = arith.mulf %137, %137 : vector<2x64xf32>
    %139 = arith.mulf %137, %138 : vector<2x64xf32>
    %cst_71 = arith.constant 4.471500e-02 : f32
    %140 = vector.broadcast %cst_71 : f32 to vector<2x64xf32>
    %141 = arith.mulf %140, %139 : vector<2x64xf32>
    %142 = arith.addf %137, %141 : vector<2x64xf32>
    %cst_72 = arith.constant 0.797884583 : f32
    %143 = vector.broadcast %cst_72 : f32 to vector<2x64xf32>
    %144 = arith.mulf %143, %142 : vector<2x64xf32>
    %145 = math.tanh %144 : vector<2x64xf32>
    %cst_73 = arith.constant 1.000000e+00 : f32
    %146 = vector.broadcast %cst_73 : f32 to vector<2x64xf32>
    %147 = arith.addf %146, %145 : vector<2x64xf32>
    %cst_74 = arith.constant 5.000000e-01 : f32
    %148 = vector.broadcast %cst_74 : f32 to vector<2x64xf32>
    %149 = arith.mulf %148, %147 : vector<2x64xf32>
    %150 = arith.mulf %137, %149 : vector<2x64xf32>
    %151 = arith.truncf %150 : vector<2x64xf32> to vector<2x64xbf16>
    %c0_75 = arith.constant 0 : index
    %c0_76 = arith.constant 0 : index
    %152 = vector.load %arg9[%c0_75, %c0_76] : memref<64x32xbf16, #tpu.memory_space<vmem>>, vector<64x32xbf16>
    %cst_77 = arith.constant dense<0.000000e+00> : vector<2x32xf32>
    %153 = tpu.matmul %151, %152, %cst_77 {dimension_numbers = #tpu.dot_dimension_numbers<[1], [0], [0], [1], [0, 0, 1, 1], [], []>} : vector<2x64xbf16>, vector<64x32xbf16>, vector<2x32xf32> -> vector<2x32xf32>
    %c3_78 = arith.constant 3 : index
    %c0_79 = arith.constant 0 : index
    %154 = vector.load %arg10[%c3_78, %c0_79] : memref<6x32xf32, #tpu.memory_space<vmem>>, vector<1x32xf32>
    %155 = vector.broadcast %154 : vector<1x32xf32> to vector<2x32xf32>
    %156 = arith.addf %153, %155 : vector<2x32xf32>
    %157 = arith.addf %131, %156 : vector<2x32xf32>
    %c4_80 = arith.constant 4 : index
    %c0_81 = arith.constant 0 : index
    %158 = vector.load %arg10[%c4_80, %c0_81] : memref<6x32xf32, #tpu.memory_space<vmem>>, vector<1x32xf32>
    %c5_82 = arith.constant 5 : index
    %c0_83 = arith.constant 0 : index
    %159 = vector.load %arg10[%c5_82, %c0_83] : memref<6x32xf32, #tpu.memory_space<vmem>>, vector<1x32xf32>
    %cst_84 = arith.constant dense<0.000000e+00> : vector<2xf32>
    %160 = vector.multi_reduction <add>, %157, %cst_84 [1] : vector<2x32xf32> to vector<2xf32>
    %161 = vector.shape_cast %160 : vector<2xf32> to vector<2x1xf32>
    %cst_85 = arith.constant 3.200000e+01 : f32
    %162 = vector.broadcast %cst_85 : f32 to vector<2x1xf32>
    %163 = arith.divf %161, %162 : vector<2x1xf32>
    %164 = vector.broadcast %163 : vector<2x1xf32> to vector<2x32xf32>
    %165 = arith.subf %157, %164 : vector<2x32xf32>
    %166 = arith.mulf %165, %165 : vector<2x32xf32>
    %cst_86 = arith.constant dense<0.000000e+00> : vector<2xf32>
    %167 = vector.multi_reduction <add>, %166, %cst_86 [1] : vector<2x32xf32> to vector<2xf32>
    %168 = vector.shape_cast %167 : vector<2xf32> to vector<2x1xf32>
    %cst_87 = arith.constant 3.200000e+01 : f32
    %169 = vector.broadcast %cst_87 : f32 to vector<2x1xf32>
    %170 = arith.divf %168, %169 : vector<2x1xf32>
    %171 = vector.broadcast %163 : vector<2x1xf32> to vector<2x32xf32>
    %172 = arith.subf %157, %171 : vector<2x32xf32>
    %cst_88 = arith.constant 9.99999974E-6 : f32
    %173 = vector.broadcast %cst_88 : f32 to vector<2x1xf32>
    %174 = arith.addf %170, %173 : vector<2x1xf32>
    %175 = math.rsqrt %174 : vector<2x1xf32>
    %176 = vector.broadcast %175 : vector<2x1xf32> to vector<2x32xf32>
    %177 = arith.mulf %172, %176 : vector<2x32xf32>
    %178 = vector.broadcast %158 : vector<1x32xf32> to vector<2x32xf32>
    %179 = arith.mulf %177, %178 : vector<2x32xf32>
    %180 = vector.broadcast %159 : vector<1x32xf32> to vector<2x32xf32>
    %181 = arith.addf %179, %180 : vector<2x32xf32>
    %182 = arith.truncf %181 : vector<2x32xf32> to vector<2x32xbf16>
    %c0_89 = arith.constant 0 : index
    %c0_90 = arith.constant 0 : index
    %183 = vector.load %arg11[%c0_89, %c0_90] : memref<32x128xbf16, #tpu.memory_space<vmem>>, vector<32x128xbf16>
    %cst_91 = arith.constant dense<0.000000e+00> : vector<2x128xf32>
    %184 = tpu.matmul %182, %183, %cst_91 {dimension_numbers = #tpu.dot_dimension_numbers<[1], [0], [0], [1], [0, 0, 1, 1], [], []>} : vector<2x32xbf16>, vector<32x128xbf16>, vector<2x128xf32> -> vector<2x128xf32>
    %c0_92 = arith.constant 0 : index
    %c0_93 = arith.constant 0 : index
    %185 = vector.load %arg12[%c0_92, %c0_93] : memref<1x128xf32, #tpu.memory_space<vmem>>, vector<1x128xf32>
    %186 = vector.broadcast %185 : vector<1x128xf32> to vector<2x128xf32>
    %187 = arith.addf %184, %186 : vector<2x128xf32>
    %c0_94 = arith.constant 0 : index
    %c0_95 = arith.constant 0 : index
    %188 = vector.load %arg13[%c0_94, %c0_95] : memref<2x128xf32, #tpu.memory_space<vmem>>, vector<2x128xf32>
    tpu.vector_store %arg13[%c0_94, %c0_95], %187 {strides = array<i32>} : memref<2x128xf32, #tpu.memory_space<vmem>>, vector<2x128xf32>,
    return
  }
}

</mosaic_0001>

<bundles_post_ra>
// kernel: pm_erc_forward.1
= control target key start
LH: loop header
LB: loop body
LE: loop exit
PB: predicated region body
PF: predicated region fallthrough
CT: control target
= control target key end

     0   :  { %v1339_v1 = vmov 0.0   ;;  %vm1340_vm0 = vmmov 0   ;;  %vm82_vm1 = vcmask 261120   ;;  %s1653_s0 = inlined_call_operand.vmem [shape: f32[16,32], index: 0, kind: input, shape index: {}]   ;;  %s1654_s1 = inlined_call_operand.vmem [shape: f32[2,32], index: 1, kind: input, shape index: {}]   ;;  %s1655_s2 = inlined_call_operand.vmem [shape: bf16[2,32,16], index: 2, kind: input, shape index: {}]   ;;  %s1656_s3 = inlined_call_operand.vmem [shape: bf16[2,32,16], index: 3, kind: input, shape index: {}]   ;;  %s1657_s4 = inlined_call_operand.vmem [shape: bf16[2,32,16], index: 4, kind: input, shape index: {}]   ;;  %s1658_s5 = inlined_call_operand.vmem [shape: f32[6,16], index: 5, kind: input, shape index: {}]   ;;  %s1659_s6 = inlined_call_operand.vmem [shape: bf16[2,16,32], index: 6, kind: input, shape index: {}]   ;;  %s1660_s7 = inlined_call_operand.vmem [shape: bf16[32,64], index: 7, kind: input, shape index: {}]   ;;  %s1661_s8 = inlined_call_operand.vmem [shape: f32[1,64], index: 8, kind: input, shape index: {}]   ;;  %s1662_s9 = inlined_call_operand.vmem [shape: bf16[64,32], index: 9, kind: input, shape index: {}]   ;;  %s1663_s10 = inlined_call_operand.vmem [shape: f32[6,32], index: 10, kind: input, shape index: {}]   ;;  %s1664_s11 = inlined_call_operand.vmem [shape: bf16[32,128], index: 11, kind: input, shape index: {}]   ;;  %s1665_s12 = inlined_call_operand.vmem [shape: f32[1,128], index: 12, kind: input, shape index: {}]   ;;  %s1666_s13 = inlined_call_operand.hbm [shape: f32[2,128], index: 13, kind: output, shape index: {}]  }
   0x1   :  { %v1281_v0 = vld [vmem:[%s1656_s3 + $0x8] sm:$0xff]   ;;  %1174 = vmatprep.subr.bf16.mxu1 %v1339_v1  ;;  %v1282_v2 = vld [vmem:[%s1656_s3] sm:$0xff]   ;;  %1166 = vmatprep.subr.bf16.mxu0 %v1339_v1 }
   0x2   :  { %1175 = vmatpush3.bf16.msra.mxu1 %v1281_v0  ;;  %v1283_v3 = vld [vmem:[%s1655_s2 + $0x8] sm:$0xff]   ;;  %1178 = vmatprep.mubr.msk.bf16.mxu1 %vm1340_vm0, %v1339_v1  ;;  %v46_v4 = vld [vmem:[%s1653_s0] sm:$0xff] }
   0x3   :  { %1176 = vmatprep.subr.bf16.mxu1 %v1339_v1  ;;  %v47_v5 = vld [vmem:[%s1653_s0 + $0x8] sm:$0xff]  ;;  %1170 = vmatprep.mubr.msk.bf16.mxu0 %vm1340_vm0, %v1339_v1  ;;  %v1284_v6 = vld [vmem:[%s1655_s2] sm:$0xff]  }
   0x4   :  { %1167 = vmatpush3.bf16.msra.mxu0 %v1283_v3  ;;  %v1440_v7 = vld [vmem:[%s1654_s1] sm:$0x3]  ;;  %v1442_v8 = vpack.c.bf16 %v47_v5, %v46_v4 }
   0x5   :  { %1168 = vmatprep.subr.bf16.mxu0 %v1339_v1  ;;  %v1447_v9 = vpack.c.bf16 %v1440_v7, %v1440_v7 }
   0x6   :  { %1177 = vmatpush3.bf16.msra.mxu1 %v1282_v2 }
   0x7   :  { %1190 = vmatprep.subr.bf16.mxu1 %v1339_v1 }
   0x8   :  { %1169 = vmatpush3.bf16.msra.mxu0 %v1284_v6 }
   0x9   :  { %1179 = vmatmul.mubr.msk.bf16.vlgmr.msra.gmra.mxu1 %vm82_vm1, %v1442_v8  ;;  %1182 = vmatprep.subr.bf16.mxu0 %v1339_v1 }
   0xa   :  { %1192 = vmatprep.mubr.msk.bf16.mxu1 %vm1340_vm0, %v1339_v1 }
   0xb   :  { %1171 = vmatmul.mubr.msk.bf16.vlgmr.msra.gmra.mxu0 %vm82_vm1, %v1447_v9 }
   0xc   :  { %1186 = vmatprep.mubr.msk.bf16.mxu0 %vm1340_vm0, %v1339_v1 }
   0xd   :  { %18 = vsyncpa [#allocation3], 0  ;;  %v1064_v11 = vld [vmem:[%s1658_s5 + $0x2] ss:$0 sm:$0xff]  ;;  %v1060_v18 = vld [vmem:[%s1658_s5] ss:$0 sm:$0xff]  ;;  %v51_v28 = vlaneseq }
   0xe   :  { %vm255_vm2 = vcmask 130048   ;;  %v1285_v26 = vld [vmem:[%s1657_s4 + $0x8] sm:$0xff]   ;;  %v1286_v27 = vld [vmem:[%s1657_s4] sm:$0xff]   ;;  %vm304_vm6 = vcmask 123904   ;;  %v1289_v56 = vld [vmem:[%s1655_s2 + $0x18] sm:$0xff]   ;;  %vm769_vm7 = vcmask 254976  }
   0xf   :  { %1183 = vmatpush3.bf16.msra.mxu0 %v1285_v26  ;;  %v52_v29 = vshrl.u32 %v51_v28, 7  ;;  %v54_v31 = vand.u32 127, %v51_v28  ;;  %v1068_v50 = vld [vmem:[%s1658_s5 + $0x4] ss:$0 sm:$0xff]  ;;  %v1290_v57 = vld [vmem:[%s1655_s2 + $0x10] sm:$0xff]   ;;  %v1287_v61 = vld [vmem:[%s1656_s3 + $0x18] sm:$0xff]  }
  0x10   :  { %1184 = vmatprep.subr.bf16.mxu0 %v1339_v1  ;;  %v1288_v63 = vld [vmem:[%s1656_s3 + $0x10] sm:$0xff]   ;;  %v1094_v34 = vld [vmem:[%s1658_s5 + $0x5] ss:$0 sm:$0xff]  ;;  %vm908_vm8 = vcmask 523264   ;;  %s1341_s15 = smov [#allocation2]  }
  0x11   :  { %v57_v30 = vadd.s32 1, %v52_v29  ;;  %v55_v32 = vmul.u32 8, %v52_v29  ;;  %s1052_s16 = sshll.u32 %s1341_s15, 4  ;;  %s1053_s16 = int_to_ptr.vmem [resolvable:$true] %s1052_s16 }
  0x12   :  { %s1317_s17 = scalar_lea.vmem %s1053_s16, 32  ;;  %p1322_p1 = scmp.lt.s32.totalorder %s1053_s16, %s1053_s16 }
  0x13   :  { %1185 = vmatpush3.bf16.msra.mxu0 %v1286_v27  ;;  %v58_v33 = vmul.u32 8, %v57_v30  ;;  %vm1482_vm3 = vcmp.ge.s32.totalorder %v54_v31, %v55_v32  ;;  %p1318_p0 = scmp.ne.s32.totalorder %s1053_s16, %s1317_s17  ;;  %p1323_p2 = scmp.lt.s32.totalorder %s1317_s17, %s1317_s17 }
  0x14   :  { %1196 = vmatprep.subr.bf16.mxu0 %v1339_v1 }
  0x15   :  { %vm1486_vm4 = vcmp.lt.s32.totalorder %v54_v31, %v58_v33  ;;  %p1324_p3 = por %p1323_p2, %p1322_p1 }
  0x16   :  { %1187 = vmatmul.mubr.msk.bf16.vlgmr.msra.gmra.mxu0 %vm82_vm1, %v1442_v8  ;;  %vm60_vm5 = vmand %vm1482_vm3, %vm1486_vm4 }
  0x17   :  { %1198 = vmatprep.mubr.msk.bf16.mxu0 %vm1340_vm0, %v1339_v1  ;;  %p1325_p4 = pnand %p1324_p3, %p1318_p0 }
  0xc9   :  { %v184_v10 = vpop.f32.mrf.mxu1 }
  0xca   :  { %v185_v16 = vadd.f32 %v1064_v11, %v184_v10 }
  0xcb   :  { %v1180_v12 = vpop.f32.mrf.mxu1  ;;  %v120_v13 = vpop.f32.mrf.mxu0 }
  0xcc   :  { %v121_v23 = vadd.f32 %v1060_v18, %v120_v13  ;;  %v1086_v12 = vld [vmem:[%s1658_s5 + $0x3] ss:$0 sm:$0xff]  ;;  %v1078_v18 = vld [vmem:[%s1658_s5 + $0x1] ss:$0 sm:$0xff] }
  0xcd   :  { %v187_v14 = vpop.f32.mrf.mxu1  ;;  %v1172_v15 = vpop.f32.mrf.mxu0 }
  0xce   :  { %v188_v17 = vadd.f32 %v1064_v11, %v187_v14  ;;  %v253_v25 = vpack.c.bf16 %v121_v23, %v121_v23  ;;  %v1291_v23 = vld [vmem:[%s1657_s4 + $0x18] sm:$0xff]  }
  0xcf   :  { %v1181_v19 = vpop.f32.mrf.mxu1  ;;  %v123_v20 = vpop.f32.mrf.mxu0 }
  0xd0   :  { %v254_v21 = vpack.c.bf16 %v188_v17, %v185_v16 }
  0xd1   :  { %v1173_v22 = vpop.f32.mrf.mxu0 }
  0xd2   :  { %v260_v24 = vsel %vm255_vm2, %v254_v21, 0 }
  0xd3   :  { %1191 = vmatpush3.bf16.xpose.msra.mxu1 %v260_v24  ;;  %v1292_v24 = vld [vmem:[%s1657_s4 + $0x10] sm:$0xff]  }
  0xd4   :  { %1202 = vmatprep.subr.bf16.mxu1 %v1339_v1 }
  0xd6   :  { %v246_v43 = vpop.f32.mrf.mxu0 }
  0xd7   :  { %v247_v51 = vadd.f32 %v1068_v50, %v246_v43 }
  0xd8   :  { %v1188_v44 = vpop.f32.mrf.mxu0 }
  0xd9   :  { %v1294_v44 = vld [vmem:[%s1659_s6 + $0x8] sm:$0xff]  }
  0xda   :  { %1193 = vmatmul.mubr.msk.bf16.vlgmr.msra.gmra.mxu1 %vm255_vm2, %v253_v25  ;;  %v249_v52 = vpop.f32.mrf.mxu0 }
  0xdb   :  { %1206 = vmatprep.mubr.msk.bf16.mxu1 %vm1340_vm0, %v1339_v1  ;;  %v250_v53 = vadd.f32 %v1068_v50, %v249_v52  ;;  %1203 = vmatpush3.bf16.msra.mxu1 %v1289_v56 }
  0xdc   :  { %v1189_v54 = vpop.f32.mrf.mxu0  ;;  %1204 = vmatprep.subr.bf16.mxu1 %v1339_v1 }
  0xdd   :  { %v317_v55 = vpack.c.bf16 %v250_v53, %v247_v51 }
  0xdf   :  { %1197 = vmatpush3.bf16.msra.mxu0 %v317_v55  ;;  %1205 = vmatpush3.bf16.msra.mxu1 %v1290_v57 }
  0xe0   :  { %1210 = vmatprep.subr.bf16.mxu0 %v1339_v1  ;;  %1218 = vmatprep.subr.bf16.mxu1 %v1339_v1 }
  0xe2   :  { %1207 = vmatmul.mubr.msk.bf16.vlgmr.msra.gmra.mxu1 %vm82_vm1, %v1447_v9 }
  0xe3   :  { %1222 = vmatprep.mubr.msk.bf16.mxu1 %vm1340_vm0, %v1339_v1  ;;  %1219 = vmatpush3.bf16.msra.mxu1 %v1291_v23 }
  0xe4   :  { %1220 = vmatprep.subr.bf16.mxu1 %v1339_v1 }
  0xe7   :  { %1221 = vmatpush3.bf16.msra.mxu1 %v1292_v24  ;;  %v1297_v24 = vld [vmem:[%s1662_s9 + $0x18] sm:$0xff]  }
  0xe8   :  { %1232 = vmatprep.subr.bf16.mxu1 %v1339_v1 }
  0xea   :  { %1223 = vmatmul.mubr.msk.bf16.vlgmr.msra.gmra.mxu1 %vm82_vm1, %v1442_v8 }
  0xeb   :  { %1234 = vmatprep.mubr.msk.bf16.mxu1 %vm1340_vm0, %v1339_v1 }
 0x19a   :  { %v296_v36 = vpop.f32.mrf.mxu1 }
 0x19b   :  { %v302_v37 = vmul.f32 0.25, %v296_v36 }
 0x19c   :  { %v1194_v38 = vpop.f32.mrf.mxu1 }
 0x19d   :  { %v303_v39 = vsel %vm60_vm5, %v302_v37, -1e+30 }
 0x19e   :  { %v299_v40 = vpop.f32.mrf.mxu1  ;;  %v305_v41 = vsel %vm304_vm6, %v303_v39, -inf }
 0x19f   :  { %306 = vmax.xlane.f32.xlu0 %v305_v41 }
 0x1a0   :  { %v1195_v42 = vpop.f32.mrf.mxu1 }
 0x1a2   :  { %v420_v0 = vpop.f32.mrf.mxu1 }
 0x1a3   :  { %v421_v20 = vadd.f32 %v1078_v18, %v420_v0  ;;  %v1107_v18 = vld [vmem:[%s1663_s10 + $0x1] ss:$0 sm:$0xff] }
 0x1a4   :  { %v1208_v2 = vpop.f32.mrf.mxu1 }
 0x1a5   :  { %v552_v22 = vpack.c.bf16 %v421_v20, %v421_v20  ;;  %v1108_v20 = vld [vmem:[%s1663_s10 + $0x2] ss:$0 sm:$0xff] }
 0x1a6   :  { %v423_v3 = vpop.f32.mrf.mxu1 }
 0x1a8   :  { %v1209_v4 = vpop.f32.mrf.mxu1 }
 0x1aa   :  { %v545_v32 = vpop.f32.mrf.mxu1 }
 0x1ab   :  { %v546_v35 = vadd.f32 %v1094_v34, %v545_v32 }
 0x1ac   :  { %v1224_v33 = vpop.f32.mrf.mxu1 }
 0x1ae   :  { %v548_v40 = vpop.f32.mrf.mxu1 }
 0x1af   :  { %v549_v41 = vadd.f32 %v1094_v34, %v548_v40 }
 0x1b0   :  { %v1225_v42 = vpop.f32.mrf.mxu1 }
 0x1b1   :  { %v614_v43 = vpack.c.bf16 %v549_v41, %v546_v35 }
 0x1b3   :  { %1233 = vmatpush3.bf16.msra.mxu1 %v614_v43  ;;  %v1113_v43 = vld [vmem:[%s1663_s10 + $0x3] ss:$0 sm:$0xff] }
 0x1b4   :  { %1244 = vmatprep.subr.bf16.mxu1 %v1339_v1 }
 0x228   :  { %v307_v45 = vpop.xlane.xlu0 %306 }
 0x229   :  { %v308_v46 = vsub.f32 %v303_v39, %v307_v45 }
 0x22b   :  { %v309_v47 = vmul.f32 1.442695, %v308_v46 }
 0x22d   :  { %1303 = vpow2.f32 %v309_v47 }
 0x23a   :  { %v1304_v48 = vpop.eup %1303 }
 0x23b   :  { %v311_v49 = vsel %vm304_vm6, %v1304_v48, 0.0 }
 0x23c   :  { %312 = vadd.xlane.f32.xlu0 %v311_v49 }
 0x2c5   :  { %v313_v58 = vpop.xlane.xlu0 %312 }
 0x2c6   :  { %1305 = vrcp.f32 %v313_v58 }
 0x2d3   :  { %v1306_v59 = vpop.eup %1305 }
 0x2d4   :  { %v315_v60 = vmul.f32 %v1306_v59, %v1304_v48  ;;  %v1293_v48 = vld [vmem:[%s1659_s6] sm:$0xff]  }
 0x2d6   :  { %v316_v62 = vpack.c.bf16 %v315_v60, %v315_v60 }
 0x2d8   :  { %1199 = vmatmul.mubr.msk.bf16.vlgmr.msra.gmra.mxu0 %vm255_vm2, %v316_v62 }
 0x2d9   :  { %1211 = vmatpush3.bf16.msra.mxu0 %v1287_v61  ;;  %1214 = vmatprep.mubr.msk.bf16.mxu0 %vm1340_vm0, %v1339_v1  ;;  %v1106_v61 = vld [vmem:[%s1663_s10] ss:$0 sm:$0xff] }
 0x2da   :  { %1212 = vmatprep.subr.bf16.mxu0 %v1339_v1 }
 0x2dd   :  { %1213 = vmatpush3.bf16.msra.mxu0 %v1288_v63 }
 0x2de   :  { %1226 = vmatprep.subr.bf16.mxu0 %v1339_v1 }
 0x2e0   :  { %1215 = vmatmul.mubr.msk.bf16.vlgmr.msra.gmra.mxu0 %vm82_vm1, %v1442_v8 }
 0x2e1   :  { %1228 = vmatprep.mubr.msk.bf16.mxu0 %vm1340_vm0, %v1339_v1 }
 0x398   :  { %v1532_v5 = vpop.f32.mrf.mxu0 }
 0x399   :  { %v361_v50 = vpack.c.bf16 %v1532_v5, %v1532_v5 }
 0x39a   :  { %v1200_v6 = vpop.f32.mrf.mxu0 }
 0x39c   :  { %v358_v9 = vpop.f32.mrf.mxu0 }
 0x39e   :  { %v1201_v10 = vpop.f32.mrf.mxu0 }
 0x3a0   :  { %v482_v11 = vpop.f32.mrf.mxu0 }
 0x3a1   :  { %v483_v15 = vadd.f32 %v1086_v12, %v482_v11 }
 0x3a2   :  { %v1216_v13 = vpop.f32.mrf.mxu0 }
 0x3a3   :  { %v1295_v13 = vld [vmem:[%s1660_s7 + $0x8] sm:$0xff]  }
 0x3a4   :  { %v485_v14 = vpop.f32.mrf.mxu0 }
 0x3a5   :  { %v486_v16 = vadd.f32 %v1086_v12, %v485_v14 }
 0x3a6   :  { %v1217_v17 = vpop.f32.mrf.mxu0 }
 0x3a7   :  { %v553_v19 = vpack.c.bf16 %v486_v16, %v483_v15 }
 0x3a9   :  { %v558_v21 = vsel %vm255_vm2, %v553_v19, 0 }
 0x3aa   :  { %1227 = vmatpush3.bf16.xpose.msra.mxu0 %v558_v21 }
 0x3ab   :  { %1238 = vmatprep.subr.bf16.mxu0 %v1339_v1 }
 0x3b1   :  { %1229 = vmatmul.mubr.msk.bf16.vlgmr.msra.gmra.mxu0 %vm255_vm2, %v552_v22 }
 0x3b2   :  { %1240 = vmatprep.mubr.msk.bf16.mxu0 %vm1340_vm0, %v1339_v1  ;;  %1239 = vmatpush3.bf16.msra.mxu0 %v1294_v44 }
 0x3b3   :  { %1250 = vmatprep.subr.bf16.mxu0 %v1339_v1 }
 0x471   :  { %v594_v25 = vpop.f32.mrf.mxu0 }
 0x472   :  { %v600_v26 = vmul.f32 0.25, %v594_v25  ;;  %v1298_v25 = vld [vmem:[%s1662_s9 + $0x10] sm:$0xff]  }
 0x473   :  { %v1230_v27 = vpop.f32.mrf.mxu0 }
 0x474   :  { %v601_v28 = vsel %vm60_vm5, %v600_v26, -1e+30  ;;  %v1299_v26 = vld [vmem:[%s1662_s9 + $0x8] sm:$0xff]   ;;  %v1300_v27 = vld [vmem:[%s1662_s9] sm:$0xff]  }
 0x475   :  { %v597_v29 = vpop.f32.mrf.mxu0  ;;  %v602_v30 = vsel %vm304_vm6, %v601_v28, -inf }
 0x476   :  { %603 = vmax.xlane.f32.xlu1 %v602_v30 }
 0x477   :  { %v1231_v31 = vpop.f32.mrf.mxu0 }
 0x4ff   :  { %v604_v8 = vpop.xlane.xlu1 %603 }
 0x500   :  { %v605_v36 = vsub.f32 %v601_v28, %v604_v8  ;;  %v1109_v28 = vld [vmem:[%s1661_s8] ss:$0 sm:$0xff] }
 0x502   :  { %v606_v37 = vmul.f32 1.442695, %v605_v36 }
 0x504   :  { %1307 = vpow2.f32 %v606_v37 }
 0x511   :  { %v1308_v38 = vpop.eup %1307 }
 0x512   :  { %v608_v39 = vsel %vm304_vm6, %v1308_v38, 0.0 }
 0x513   :  { %609 = vadd.xlane.f32.xlu1 %v608_v39 }
 0x59c   :  { %v610_v45 = vpop.xlane.xlu1 %609 }
 0x59d   :  { %1309 = vrcp.f32 %v610_v45 }
 0x5aa   :  { %v1310_v46 = vpop.eup %1309 }
 0x5ab   :  { %v612_v47 = vmul.f32 %v1310_v46, %v1308_v38 }
 0x5ad   :  { %v613_v49 = vpack.c.bf16 %v612_v47, %v612_v47 }
 0x5af   :  { %1235 = vmatmul.mubr.msk.bf16.vlgmr.msra.gmra.mxu1 %vm255_vm2, %v613_v49 }
 0x5b0   :  { %1245 = vmatpush3.bf16.msra.mxu1 %v1293_v48  ;;  %1246 = vmatprep.mubr.msk.bf16.mxu1 %vm1340_vm0, %v1339_v1 }
 0x5b1   :  { %1258 = vmatprep.subr.bf16.mxu1 %v1339_v1 }
 0x5b7   :  { %1247 = vmatmul.mubr.msk.bf16.vlgmr.msra.gmra.mxu1 %vm255_vm2, %v361_v50 }
 0x5b8   :  { %1266 = vmatprep.mubr.msk.bf16.mxu1 %vm1340_vm0, %v1339_v1  ;;  %1259 = vmatpush3.bf16.msra.mxu1 %v1297_v24 }
 0x5b9   :  { %1260 = vmatprep.subr.bf16.mxu1 %v1339_v1 }
 0x5bc   :  { %1261 = vmatpush3.bf16.msra.mxu1 %v1298_v25 }
 0x5bd   :  { %1262 = vmatprep.subr.bf16.mxu1 %v1339_v1 }
 0x5c0   :  { %1263 = vmatpush3.bf16.msra.mxu1 %v1299_v26 }
 0x5c1   :  { %1264 = vmatprep.subr.bf16.mxu1 %v1339_v1 }
 0x5c4   :  { %1265 = vmatpush3.bf16.msra.mxu1 %v1300_v27 }
 0x66f   :  { %v652_v51 = vpop.f32.mrf.mxu1 }
 0x670   :  { %v658_v52 = vpack.c.bf16 %v652_v51, %v652_v51 }
 0x671   :  { %v1236_v53 = vpop.f32.mrf.mxu1 }
 0x672   :  { %1241 = vmatmul.mubr.msk.bf16.vlgmr.msra.gmra.mxu0 %vm255_vm2, %v658_v52 }
 0x673   :  { %v655_v54 = vpop.f32.mrf.mxu1  ;;  %1254 = vmatprep.mubr.msk.bf16.mxu0 %vm1340_vm0, %v1339_v1  ;;  %1251 = vmatpush3.bf16.msra.mxu0 %v1295_v13 }
 0x674   :  { %1252 = vmatprep.subr.bf16.mxu0 %v1339_v1 }
 0x675   :  { %v1237_v55 = vpop.f32.mrf.mxu1 }
 0x677   :  { %v754_v56 = vpop.f32.mrf.mxu1 }
 0x679   :  { %v1248_v57 = vpop.f32.mrf.mxu1 }
 0x67a   :  { %v1302_v57 = vld [vmem:[%s1664_s11] sm:$0xff]  }
 0x67b   :  { %v757_v58 = vpop.f32.mrf.mxu1 }
 0x67d   :  { %v1249_v59 = vpop.f32.mrf.mxu1 }
 0x732   :  { %v705_v60 = vpop.f32.mrf.mxu0 }
 0x733   :  { %v755_v62 = vadd.f32 %v754_v56, %v705_v60  ;;  %v1301_v56 = vld [vmem:[%s1664_s11 + $0x8] sm:$0xff]  }
 0x734   :  { %v1242_v63 = vpop.f32.mrf.mxu0 }
 0x735   :  { %v765_v0 = vadd.f32 %v1106_v61, %v755_v62  ;;  %v1119_v62 = vld [vmem:[%s1663_s10 + $0x4] ss:$0 sm:$0xff] }
 0x736   :  { %v708_v2 = vpop.f32.mrf.mxu0 }
 0x737   :  { %v766_v3 = vadd.f32 %v765_v0, %v1440_v7  ;;  %v1296_v7 = vld [vmem:[%s1660_s7] sm:$0xff]  }
 0x738   :  { %v1243_v4 = vpop.f32.mrf.mxu0  ;;  %1253 = vmatpush3.bf16.msra.mxu0 %v1296_v7  ;;  %v1120_v0 = vld [vmem:[%s1663_s10 + $0x5] ss:$0 sm:$0xff] }
 0x739   :  { %v770_v5 = vsel %vm769_vm7, %v766_v3, 0.0  ;;  %1270 = vmatprep.subr.bf16.mxu0 %v1339_v1 }
 0x73a   :  { %771 = vadd.xlane.f32.xlu0 %v770_v5 }
 0x7c3   :  { %v772_v6 = vpop.xlane.xlu0 %771 }
 0x7c4   :  { %v774_v9 = vmul.f32 0.03125, %v772_v6 }
 0x7c6   :  { %v775_v10 = vsub.f32 %v766_v3, %v774_v9 }
 0x7c8   :  { %v776_v11 = vmul.f32 %v775_v10, %v775_v10 }
 0x7ca   :  { %v777_v12 = vsel %vm769_vm7, %v776_v11, 0.0 }
 0x7cb   :  { %778 = vadd.xlane.f32.xlu1 %v777_v12 }
 0x854   :  { %v779_v14 = vpop.xlane.xlu1 %778 }
 0x855   :  { %v780_v15 = vmul.f32 0.03125, %v779_v14 }
 0x857   :  { %v781_v16 = vadd.f32 1e-05, %v780_v15 }
 0x859   :  { %1311 = vrsqrt.f32 %v781_v16 }
 0x866   :  { %v1312_v17 = vpop.eup %1311 }
 0x867   :  { %v783_v19 = vmul.f32 %v1312_v17, %v775_v10 }
 0x869   :  { %v788_v21 = vmul.f32 %v1107_v18, %v783_v19 }
 0x86b   :  { %v793_v22 = vadd.f32 %v1108_v20, %v788_v21 }
 0x86d   :  { %v794_v23 = vpack.c.bf16 %v793_v22, %v793_v22 }
 0x86f   :  { %1255 = vmatmul.mubr.msk.bf16.vlgmr.msra.gmra.mxu0 %vm82_vm1, %v794_v23 }
 0x870   :  { %1274 = vmatprep.mubr.msk.bf16.mxu0 %vm1340_vm0, %v1339_v1  ;;  %1271 = vmatpush3.bf16.msra.mxu0 %v1301_v56 }
 0x871   :  { %1272 = vmatprep.subr.bf16.mxu0 %v1339_v1  ;;  %v1121_v1 = vld [vmem:[%s1665_s12] ss:$0 sm:$0xff] }
 0x874   :  { %1273 = vmatpush3.bf16.msra.mxu0 %v1302_v57 }
 0x92f   :  { %v855_v29 = vpop.f32.mrf.mxu0 }
 0x930   :  { %v856_v30 = vadd.f32 %v1109_v28, %v855_v29 }
 0x931   :  { %v1256_v31 = vpop.f32.mrf.mxu0 }
 0x932   :  { %v861_v32 = vmul.f32 %v856_v30, %v856_v30 }
 0x933   :  { %v858_v33 = vpop.f32.mrf.mxu0 }
 0x934   :  { %v862_v8 = vmul.f32 %v861_v32, %v856_v30 }
 0x935   :  { %v1257_v36 = vpop.f32.mrf.mxu0 }
 0x936   :  { %v863_v37 = vmul.f32 0.044715, %v862_v8 }
 0x938   :  { %v864_v38 = vadd.f32 %v863_v37, %v856_v30 }
 0x93a   :  { %v865_v39 = vmul.f32 0.7978846, %v864_v38 }
 0x93c   :  { %1313 = vtanh.f32 %v865_v39 }
 0x949   :  { %v1314_v34 = vpop.eup %1313 }
 0x94a   :  { %v867_v35 = vadd.f32 1.0, %v1314_v34 }
 0x94c   :  { %v868_v40 = vmul.f32 0.5, %v867_v35 }
 0x94e   :  { %v869_v41 = vmul.f32 %v868_v40, %v856_v30 }
 0x950   :  { %v870_v42 = vpack.c.bf16 %v869_v41, %v869_v41 }
 0x952   :  { %1267 = vmatmul.mubr.msk.bf16.vlgmr.msra.gmra.mxu1 %vm908_vm8, %v870_v42 }
 0xa12   :  { %v946_v44 = vpop.f32.mrf.mxu1 }
 0xa13   :  { %v947_v45 = vadd.f32 %v1113_v43, %v946_v44 }
 0xa14   :  { %v1268_v46 = vpop.f32.mrf.mxu1 }
 0xa15   :  { %v952_v47 = vadd.f32 %v947_v45, %v793_v22 }
 0xa16   :  { %v949_v48 = vpop.f32.mrf.mxu1 }
 0xa17   :  { %v955_v49 = vsel %vm769_vm7, %v952_v47, 0.0 }
 0xa18   :  { %956 = vadd.xlane.f32.xlu0 %v955_v49  ;;  %v1269_v50 = vpop.f32.mrf.mxu1 }
 0xaa1   :  { %v957_v51 = vpop.xlane.xlu0 %956 }
 0xaa2   :  { %v958_v52 = vmul.f32 0.03125, %v957_v51 }
 0xaa4   :  { %v959_v53 = vsub.f32 %v952_v47, %v958_v52 }
 0xaa6   :  { %v960_v54 = vmul.f32 %v959_v53, %v959_v53 }
 0xaa8   :  { %v961_v55 = vsel %vm769_vm7, %v960_v54, 0.0 }
 0xaa9   :  { %962 = vadd.xlane.f32.xlu1 %v961_v55 }
 0xb32   :  { %v963_v58 = vpop.xlane.xlu1 %962 }
 0xb33   :  { %v964_v59 = vmul.f32 0.03125, %v963_v58 }
 0xb35   :  { %v965_v60 = vadd.f32 1e-05, %v964_v59 }
 0xb37   :  { %1315 = vrsqrt.f32 %v965_v60 }
 0xb44   :  { %v1316_v61 = vpop.eup %1315 }
 0xb45   :  { %v967_v63 = vmul.f32 %v1316_v61, %v959_v53 }
 0xb47   :  { %v972_v2 = vmul.f32 %v1119_v62, %v967_v63 }
 0xb49   :  { %v977_v3 = vadd.f32 %v1120_v0, %v972_v2 }
 0xb4b   :  { %v978_v4 = vpack.c.bf16 %v977_v3, %v977_v3 }
 0xb4d   :  { %1275 = vmatmul.mubr.msk.bf16.vlgmr.msra.gmra.mxu0 %vm82_vm1, %v978_v4 }
 0xc0d   :  { %v1039_v5 = vpop.f32.mrf.mxu0 }
 0xc0e   :  { %v1040_v6 = vadd.f32 %v1121_v1, %v1039_v5 }
 0xc0f   :  { %v1276_v9 = vpop.f32.mrf.mxu0 }
 0xc10   :  { %1045 = vst [vmem:[#allocation2] sm:$0x3] %v1040_v6 }
 0xc11   :  { %v1042_v10 = vpop.f32.mrf.mxu0 }
 0xc12   :  { %1328 = shalt.err (!%p1325_p4)
}
 0xc13   :  { %1055 = dma.vmem_to_hbm [thread:$0]  %s1053_s16, 32, %s1666_s13, [#allocation3]   ;;  %v1277_v11 = vpop.f32.mrf.mxu0 }
 0xc14   :  { %1337 = dma.done.wait [#allocation3], 32  }
 0xc15   :  { %1338 = vsyncadd [#allocation3], 4294967264 }
 0xc16   :  { %1059 = vsyncpa [#allocation3], 1 }

</bundles_post_ra>
